<compile_context>
chip_gen: v7x
topology: tpu7x:2x2x1
jax: 0.10.0
libtpu: 0.0.40
codegen_flags: <defaults>
</compile_context>

<pallas_src>
import functools
import math

import jax
import jax.numpy as jnp
from jax.experimental import pallas as pl
from jax.experimental.pallas import tpu as pltpu

# ----------------------------- config --------------------------------------
ALPHA = 0.1      # SReLU alpha
BETA_S = 0.8     # SReLU beta
BN_EPS = 1e-5
_VMEM_LIMIT = 32 * 1024 * 1024   # safe scoped-VMEM budget on v5e / v6e / v7x


# ------------------------- Pallas kernels ----------------------------------
def _gemm_stats_kernel(x_ref, w_ref, y_ref, sum_ref, sq_ref):
    """Fused deconv-GEMM + per-lane sum / sum-of-squares grid reduction."""
    @pl.when(pl.program_id(0) == 0)
    def _():
        sum_ref[...] = jnp.zeros_like(sum_ref)
        sq_ref[...] = jnp.zeros_like(sq_ref)

    y = jnp.dot(x_ref[...], w_ref[...], preferred_element_type=jnp.float32)
    y_ref[...] = y
    # Row reduction goes to the XLU slot; accumulators stay resident in VMEM.
    sum_ref[...] += jnp.sum(y, axis=0, keepdims=True)
    sq_ref[...] += jnp.sum(y * y, axis=0, keepdims=True)


def _bn_srelu_kernel(y_ref, scale_ref, shift_ref, o_ref):
    """Fused BatchNorm (folded affine) + SReLU on a lane-dense slab.

    SReLU simplification (algebraically identical to the PyTorch module):
      x >= 0 : (1+alpha)*x + beta*x*sigmoid(x)
      x <  0 : 2*alpha*x + beta*(1+beta)*x*sigmoid(x)
    """
    x = y_ref[...] * scale_ref[...] + shift_ref[...]
    s = jax.nn.sigmoid(x)                                    # EUP slot
    coef_pos = (1.0 + ALPHA) + BETA_S * s
    coef_neg = (2.0 * ALPHA) + (BETA_S * (1.0 + BETA_S)) * s
    o_ref[...] = x * jnp.where(x >= 0.0, coef_pos, coef_neg)


# ------------------------------ pallas wrappers -----------------------------
def _gemm_stats(x2d, w2d, tr):
    mr, k = x2d.shape
    _, lw = w2d.shape
    return pl.pallas_call(
        _gemm_stats_kernel,
        out_shape=(
            jax.ShapeDtypeStruct((mr, lw), jnp.float32),   # pre-scatter activations
            jax.ShapeDtypeStruct((1, lw), jnp.float32),    # per-lane sum
            jax.ShapeDtypeStruct((1, lw), jnp.float32),    # per-lane sum of squares
        ),
        grid_spec=pltpu.PrefetchScalarGridSpec(
            num_scalar_prefetch=0,
            grid=(mr // tr,),
            in_specs=[
                pl.BlockSpec((tr, k), lambda i: (i, 0)),
                pl.BlockSpec((k, lw), lambda i: (0, 0)),
            ],
            out_specs=[
                pl.BlockSpec((tr, lw), lambda i: (i, 0)),
                pl.BlockSpec((1, lw), lambda i: (0, 0)),
                pl.BlockSpec((1, lw), lambda i: (0, 0)),
            ],
        ),
        compiler_params=pltpu.CompilerParams(
            dimension_semantics=("arbitrary",),            # stats accumulate across grid
            vmem_limit_bytes=_VMEM_LIMIT,
        ),
    )(x2d, w2d)


def _bn_srelu(y, scale_row, shift_row, tr):
    mr, lw = y.shape
    return pl.pallas_call(
        _bn_srelu_kernel,
        out_shape=jax.ShapeDtypeStruct((mr, lw), jnp.float32),
        grid_spec=pltpu.PrefetchScalarGridSpec(
            num_scalar_prefetch=0,
            grid=(mr // tr,),
            in_specs=[
                pl.BlockSpec((tr, lw), lambda i: (i, 0)),
                pl.BlockSpec((1, lw), lambda i: (0, 0)),
                pl.BlockSpec((1, lw), lambda i: (0, 0)),
            ],
            out_specs=pl.BlockSpec((tr, lw), lambda i: (i, 0)),
        ),
        compiler_params=pltpu.CompilerParams(
            dimension_semantics=("parallel",),
            vmem_limit_bytes=_VMEM_LIMIT,
        ),
    )(y, scale_row, shift_row)


# ------------------------------ helpers --------------------------------------
def _round_up(a, b):
    return -(-a // b) * b


def _pick_row_tile(total_rows, bytes_per_row, target_bytes=2 << 20, cap=4096):
    """Row-tile sized toward ~2 MB blocks, multiple of 8 (sublane)."""
    tr = target_bytes // max(bytes_per_row, 1)
    tr = max(8, min(tr, cap, _round_up(max(total_rows, 1), 8)))
    return (tr // 8) * 8


# ------------------------------ forward --------------------------------------
@functools.partial(jax.jit, static_argnames=("kernel_size", "stride"))
def conv_transpose_bn_relu(x_nchw, weight, gamma, beta, *, kernel_size=2, stride=2):
    """x_nchw: (N, Cin, H, W); weight: (Cin, Cout, kh, kw). Returns (N, Cout, 2H, 2W)."""
    # TODO(synk): only the non-overlapping kernel_size=2, stride=2 configuration of the
    # PyTorch module is implemented (exact GEMM form); k=3/4 paths are not translated.
    assert kernel_size == 2 and stride == 2
    N, Cin, H, W = x_nchw.shape
    _, Cout, kh, kw = weight.shape
    Ccol = kh * kw * Cout            # GEMM output columns (kernel-position-major, Cout minor)
    M = N * H * W                    # GEMM rows
    count = M * kh * kw              # elements per channel for BN statistics

    # --- lane-dense packing: lane width LW = multiple of both 128 and Ccol -------------
    LW = (128 * Ccol) // math.gcd(128, Ccol)
    G = LW // Ccol                   # logical rows packed per lane-dense row
    K = G * Cin                      # expanded contraction depth
    if K > 512 or K * LW * 4 > (4 << 20):
        LW, G, K = Ccol, 1, Cin      # fallback: plain (M, Ccol) layout for awkward Cout

    # --- GEMM operands (NHWC-derived) ---------------------------------------------------
    x_flat = jnp.transpose(x_nchw, (0, 2, 3, 1)).reshape(M, Cin).astype(jnp.float32)
    w_flat = jnp.transpose(weight, (0, 2, 3, 1)).reshape(Cin, Ccol).astype(jnp.float32)
    if G == 1:
        w2d = w_flat
    else:
        # block-diagonal weight: w2d[g*Cin + c, g*Ccol + j] = w_flat[c, j]
        eye = jnp.eye(G, dtype=jnp.float32)
        w2d = jnp.einsum("gh,cj->gchj", eye, w_flat).reshape(K, LW)

    # --- row tiling + zero padding (no tail rows dropped; zeros don't affect stats) ----
    Mrows = -(-M // G)
    tr = _pick_row_tile(Mrows, (K + 2 * LW) * 4)
    Mrows_pad = _round_up(Mrows, tr)
    Mpad = Mrows_pad * G
    if Mpad != M:
        x_flat = jnp.pad(x_flat, ((0, Mpad - M), (0, 0)))
    x2d = x_flat.reshape(Mrows_pad, K)   # free reshape: lane-dense GEMM LHS

    # --- Pallas kernel 1: deconv GEMM + fused channel statistics -----------------------
    y, lane_sum, lane_sq = _gemm_stats(x2d, w2d, tr)

    # fold lanes -> channels (lane l belongs to output channel l % Cout)
    ch_sum = jnp.sum(lane_sum.reshape(LW // Cout, Cout), axis=0)
    ch_sq = jnp.sum(lane_sq.reshape(LW // Cout, Cout), axis=0)
    mean = ch_sum / count
    var = ch_sq / count - mean * mean    # biased variance (PyTorch BN train-mode)
    scale_c = gamma.astype(jnp.float32) / jnp.sqrt(var + BN_EPS)
    shift_c = beta.astype(jnp.float32) - mean * scale_c
    scale_row = jnp.tile(scale_c, LW // Cout)[None, :]
    shift_row = jnp.tile(shift_c, LW // Cout)[None, :]

    # --- Pallas kernel 2: fused BN-apply + SReLU on the pre-scatter lane-dense slab ----
    z = _bn_srelu(y, scale_row, shift_row, tr)

    # --- single XLA pass: kh/kw spatial scatter + NCHW permute in ONE transpose --------
    z = z.reshape(Mpad, Ccol)[:M].reshape(N, H, W, kh, kw, Cout)
    out = jnp.transpose(z, (0, 5, 1, 3, 2, 4)).reshape(N, Cout, H * stride, W * stride)
    return out


# ----------------------------- reference ------------------------------------
def _reference(x_nchw, weight, gamma, beta):
    N, Cin, H, W = x_nchw.shape
    _, Cout, kh, kw = weight.shape
    t = jnp.einsum("nchw,coij->nhiwjo", x_nchw, weight)        # (N,H,kh,W,kw,Cout)
    conv = t.reshape(N, H * 2, W * 2, Cout)                    # NHWC
    mean = jnp.mean(conv, axis=(0, 1, 2))
    var = jnp.mean((conv - mean) ** 2, axis=(0, 1, 2))
    xh = (conv - mean) / jnp.sqrt(var + BN_EPS) * gamma + beta
    neg = ALPHA * (xh - jnp.maximum(-xh, 0.0))
    pos = jnp.maximum(xh, 0.0)
    trn = BETA_S * (xh - jnp.maximum(-BETA_S * xh, 0.0)) * jax.nn.sigmoid(xh)
    return jnp.transpose(neg + pos + trn, (0, 3, 1, 2))        # NCHW


# ------------------------------- main ---------------------------------------
if __name__ == "__main__":
    key = jax.random.PRNGKey(0)
    k_x, k_w = jax.random.split(key)

    N, Cin, H, W = 2, 4, 16, 16
    Cout, KS, STRIDE = 8, 2, 2

    x = jax.random.normal(k_x, (N, Cin, H, W), dtype=jnp.float32)
    # ConvTranspose2d weight shape: (in_channels, out_channels, kh, kw)
    fan = Cin * KS * KS
    bound = 1.0 / (fan ** 0.5)
    weight = jax.random.uniform(k_w, (Cin, Cout, KS, KS), jnp.float32, -bound, bound)
    gamma = jnp.ones((Cout,), jnp.float32)   # BN affine defaults
    beta = jnp.zeros((Cout,), jnp.float32)

    out = conv_transpose_bn_relu(x, weight, gamma, beta, kernel_size=KS, stride=STRIDE)
    out = jax.block_until_ready(out)

    ref = _reference(x, weight, gamma, beta)
    assert out.shape == (N, Cout, H * STRIDE, W * STRIDE), out.shape
    assert jnp.allclose(out, ref, atol=1e-4, rtol=1e-4), float(jnp.max(jnp.abs(out - ref)))

    print("KERNEL_OK")
</pallas_src>

<mosaic_0001>
module attributes {stable_mosaic.version = 11 : i64} {
  func.func @_gemm_stats_kernel(%arg0: i32, %arg1: memref<128x16xf32, #tpu.memory_space<vmem>>, %arg2: memref<16x128xf32, #tpu.memory_space<vmem>>, %arg3: memref<128x128xf32, #tpu.memory_space<vmem>>, %arg4: memref<1x128xf32, #tpu.memory_space<vmem>>, %arg5: memref<1x128xf32, #tpu.memory_space<vmem>>) attributes {dimension_semantics = [#tpu.dimension_semantics<arbitrary>], iteration_bounds = array<i64: 1>, scalar_prefetch = 0 : i64, scratch_operands = 0 : i64, tpu.core_type = #tpu.core_type<tc>, window_params = [{transform_indices = @transform_0, window_bounds = array<i64: 128, 16>}, {pipeline_mode = #tpu.pipeline_mode<synchronous>, transform_indices = @transform_1, window_bounds = array<i64: 16, 128>}, {transform_indices = @transform_2, window_bounds = array<i64: 128, 128>}, {pipeline_mode = #tpu.pipeline_mode<synchronous>, transform_indices = @transform_3, window_bounds = array<i64: 1, 128>}, {pipeline_mode = #tpu.pipeline_mode<synchronous>, transform_indices = @transform_4, window_bounds = array<i64: 1, 128>}]} {
    %c0_i32 = arith.constant 0 : i32
    %0 = arith.cmpi eq, %arg0, %c0_i32 : i32
    %1 = arith.extui %0 : i1 to i32
    %c0_i32_0 = arith.constant 0 : i32
    %2 = arith.cmpi ne, %1, %c0_i32_0 : i32
    scf.if %2 {
      %cst_16 = arith.constant 0.000000e+00 : f32
      %18 = vector.broadcast %cst_16 : f32 to vector<1x128xf32>
      %c0_17 = arith.constant 0 : index
      %c0_18 = arith.constant 0 : index
      %19 = vector.load %arg4[%c0_17, %c0_18] : memref<1x128xf32, #tpu.memory_space<vmem>>, vector<1x128xf32>
      tpu.vector_store %arg4[%c0_17, %c0_18], %18 {strides = array<i32>} : memref<1x128xf32, #tpu.memory_space<vmem>>, vector<1x128xf32>,
      %cst_19 = arith.constant 0.000000e+00 : f32
      %20 = vector.broadcast %cst_19 : f32 to vector<1x128xf32>
      %c0_20 = arith.constant 0 : index
      %c0_21 = arith.constant 0 : index
      %21 = vector.load %arg5[%c0_20, %c0_21] : memref<1x128xf32, #tpu.memory_space<vmem>>, vector<1x128xf32>
      tpu.vector_store %arg5[%c0_20, %c0_21], %20 {strides = array<i32>} : memref<1x128xf32, #tpu.memory_space<vmem>>, vector<1x128xf32>,
    } else {
    }
    %c0 = arith.constant 0 : index
    %c0_1 = arith.constant 0 : index
    %3 = vector.load %arg1[%c0, %c0_1] : memref<128x16xf32, #tpu.memory_space<vmem>>, vector<128x16xf32>
    %c0_2 = arith.constant 0 : index
    %c0_3 = arith.constant 0 : index
    %4 = vector.load %arg2[%c0_2, %c0_3] : memref<16x128xf32, #tpu.memory_space<vmem>>, vector<16x128xf32>
    %cst = arith.constant dense<0.000000e+00> : vector<128x128xf32>
    %5 = tpu.matmul %3, %4, %cst {dimension_numbers = #tpu.dot_dimension_numbers<[1], [0], [0], [1], [0, 0, 1, 1], [], []>} : vector<128x16xf32>, vector<16x128xf32>, vector<128x128xf32> -> vector<128x128xf32>
    %c0_4 = arith.constant 0 : index
    %c0_5 = arith.constant 0 : index
    %6 = vector.load %arg3[%c0_4, %c0_5] : memref<128x128xf32, #tpu.memory_space<vmem>>, vector<128x128xf32>
    tpu.vector_store %arg3[%c0_4, %c0_5], %5 {strides = array<i32>} : memref<128x128xf32, #tpu.memory_space<vmem>>, vector<128x128xf32>,
    %c0_6 = arith.constant 0 : index
    %c0_7 = arith.constant 0 : index
    %7 = vector.load %arg4[%c0_6, %c0_7] : memref<1x128xf32, #tpu.memory_space<vmem>>, vector<1x128xf32>
    %cst_8 = arith.constant dense<0.000000e+00> : vector<128xf32>
    %8 = vector.multi_reduction <add>, %5, %cst_8 [0] : vector<128x128xf32> to vector<128xf32>
    %9 = vector.shape_cast %8 : vector<128xf32> to vector<1x128xf32>
    %10 = arith.addf %7, %9 : vector<1x128xf32>
    %c0_9 = arith.constant 0 : index
    %c0_10 = arith.constant 0 : index
    %11 = vector.load %arg4[%c0_9, %c0_10] : memref<1x128xf32, #tpu.memory_space<vmem>>, vector<1x128xf32>
    tpu.vector_store %arg4[%c0_9, %c0_10], %10 {strides = array<i32>} : memref<1x128xf32, #tpu.memory_space<vmem>>, vector<1x128xf32>,
    %c0_11 = arith.constant 0 : index
    %c0_12 = arith.constant 0 : index
    %12 = vector.load %arg5[%c0_11, %c0_12] : memref<1x128xf32, #tpu.memory_space<vmem>>, vector<1x128xf32>
    %13 = arith.mulf %5, %5 : vector<128x128xf32>
    %cst_13 = arith.constant dense<0.000000e+00> : vector<128xf32>
    %14 = vector.multi_reduction <add>, %13, %cst_13 [0] : vector<128x128xf32> to vector<128xf32>
    %15 = vector.shape_cast %14 : vector<128xf32> to vector<1x128xf32>
    %16 = arith.addf %12, %15 : vector<1x128xf32>
    %c0_14 = arith.constant 0 : index
    %c0_15 = arith.constant 0 : index
    %17 = vector.load %arg5[%c0_14, %c0_15] : memref<1x128xf32, #tpu.memory_space<vmem>>, vector<1x128xf32>
    tpu.vector_store %arg5[%c0_14, %c0_15], %16 {strides = array<i32>} : memref<1x128xf32, #tpu.memory_space<vmem>>, vector<1x128xf32>,
    return
  }
  func.func @transform_0(%arg0: i32) -> (i32, i32) {
    %c0_i32 = arith.constant 0 : i32
    %c0_i32_0 = arith.constant 0 : i32
    return %arg0, %c0_i32 : i32, i32
  }
  func.func @transform_1(%arg0: i32) -> (i32, i32) {
    %c0_i32 = arith.constant 0 : i32
    %c0_i32_0 = arith.constant 0 : i32
    %c0_i32_1 = arith.constant 0 : i32
    return %c0_i32, %c0_i32_0 : i32, i32
  }
  func.func @transform_2(%arg0: i32) -> (i32, i32) {
    %c0_i32 = arith.constant 0 : i32
    %c0_i32_0 = arith.constant 0 : i32
    return %arg0, %c0_i32 : i32, i32
  }
  func.func @transform_3(%arg0: i32) -> (i32, i32) {
    %c0_i32 = arith.constant 0 : i32
    %c0_i32_0 = arith.constant 0 : i32
    %c0_i32_1 = arith.constant 0 : i32
    return %c0_i32, %c0_i32_0 : i32, i32
  }
  func.func @transform_4(%arg0: i32) -> (i32, i32) {
    %c0_i32 = arith.constant 0 : i32
    %c0_i32_0 = arith.constant 0 : i32
    %c0_i32_1 = arith.constant 0 : i32
    return %c0_i32, %c0_i32_0 : i32, i32
  }
}

module attributes {stable_mosaic.version = 11 : i64} {
  func.func @_bn_srelu_kernel(%arg0: i32, %arg1: memref<128x128xf32, #tpu.memory_space<vmem>>, %arg2: memref<1x128xf32, #tpu.memory_space<vmem>>, %arg3: memref<1x128xf32, #tpu.memory_space<vmem>>, %arg4: memref<128x128xf32, #tpu.memory_space<vmem>>) attributes {dimension_semantics = [#tpu.dimension_semantics<parallel>], iteration_bounds = array<i64: 1>, scalar_prefetch = 0 : i64, scratch_operands = 0 : i64, tpu.core_type = #tpu.core_type<tc>, window_params = [{transform_indices = @transform_0, window_bounds = array<i64: 128, 128>}, {pipeline_mode = #tpu.pipeline_mode<synchronous>, transform_indices = @transform_1, window_bounds = array<i64: 1, 128>}, {pipeline_mode = #tpu.pipeline_mode<synchronous>, transform_indices = @transform_2, window_bounds = array<i64: 1, 128>}, {transform_indices = @transform_3, window_bounds = array<i64: 128, 128>}]} {
    %c0 = arith.constant 0 : index
    %c0_0 = arith.constant 0 : index
    %0 = vector.load %arg1[%c0, %c0_0] : memref<128x128xf32, #tpu.memory_space<vmem>>, vector<128x128xf32>
    %c0_1 = arith.constant 0 : index
    %c0_2 = arith.constant 0 : index
    %1 = vector.load %arg2[%c0_1, %c0_2] : memref<1x128xf32, #tpu.memory_space<vmem>>, vector<1x128xf32>
    %2 = vector.broadcast %1 : vector<1x128xf32> to vector<128x128xf32>
    %3 = arith.mulf %0, %2 : vector<128x128xf32>
    %c0_3 = arith.constant 0 : index
    %c0_4 = arith.constant 0 : index
    %4 = vector.load %arg3[%c0_3, %c0_4] : memref<1x128xf32, #tpu.memory_space<vmem>>, vector<1x128xf32>
    %5 = vector.broadcast %4 : vector<1x128xf32> to vector<128x128xf32>
    %6 = arith.addf %3, %5 : vector<128x128xf32>
    %7 = arith.negf %6 : vector<128x128xf32>
    %8 = math.exp %7 : vector<128x128xf32>
    %cst = arith.constant 1.000000e+00 : f32
    %9 = vector.broadcast %cst : f32 to vector<128x128xf32>
    %10 = arith.addf %9, %8 : vector<128x128xf32>
    %11 = arith.divf %9, %10 : vector<128x128xf32>
    %cst_5 = arith.constant 8.000000e-01 : f32
    %12 = vector.broadcast %cst_5 : f32 to vector<128x128xf32>
    %13 = arith.mulf %12, %11 : vector<128x128xf32>
    %cst_6 = arith.constant 1.100000e+00 : f32
    %14 = vector.broadcast %cst_6 : f32 to vector<128x128xf32>
    %15 = arith.addf %14, %13 : vector<128x128xf32>
    %cst_7 = arith.constant 1.440000e+00 : f32
    %16 = vector.broadcast %cst_7 : f32 to vector<128x128xf32>
    %17 = arith.mulf %16, %11 : vector<128x128xf32>
    %cst_8 = arith.constant 2.000000e-01 : f32
    %18 = vector.broadcast %cst_8 : f32 to vector<128x128xf32>
    %19 = arith.addf %18, %17 : vector<128x128xf32>
    %cst_9 = arith.constant 0.000000e+00 : f32
    %20 = vector.broadcast %cst_9 : f32 to vector<128x128xf32>
    %21 = arith.cmpf oge, %6, %20 : vector<128x128xf32>
    %22 = arith.select %21, %15, %19 : vector<128x128xi1>, vector<128x128xf32>
    %23 = arith.mulf %6, %22 : vector<128x128xf32>
    %c0_10 = arith.constant 0 : index
    %c0_11 = arith.constant 0 : index
    %24 = vector.load %arg4[%c0_10, %c0_11] : memref<128x128xf32, #tpu.memory_space<vmem>>, vector<128x128xf32>
    tpu.vector_store %arg4[%c0_10, %c0_11], %23 {strides = array<i32>} : memref<128x128xf32, #tpu.memory_space<vmem>>, vector<128x128xf32>,
    return
  }
  func.func @transform_0(%arg0: i32) -> (i32, i32) {
    %c0_i32 = arith.constant 0 : i32
    %c0_i32_0 = arith.constant 0 : i32
    return %arg0, %c0_i32 : i32, i32
  }
  func.func @transform_1(%arg0: i32) -> (i32, i32) {
    %c0_i32 = arith.constant 0 : i32
    %c0_i32_0 = arith.constant 0 : i32
    %c0_i32_1 = arith.constant 0 : i32
    return %c0_i32, %c0_i32_0 : i32, i32
  }
  func.func @transform_2(%arg0: i32) -> (i32, i32) {
    %c0_i32 = arith.constant 0 : i32
    %c0_i32_0 = arith.constant 0 : i32
    %c0_i32_1 = arith.constant 0 : i32
    return %c0_i32, %c0_i32_0 : i32, i32
  }
  func.func @transform_3(%arg0: i32) -> (i32, i32) {
    %c0_i32 = arith.constant 0 : i32
    %c0_i32_0 = arith.constant 0 : i32
    return %arg0, %c0_i32 : i32, i32
  }
}

</mosaic_0001>

<bundles_post_ra>
// kernel: tile.18
= control target key start
LH: loop header
LB: loop body
LE: loop exit
PB: predicated region body
PF: predicated region fallthrough
CT: control target
= control target key end

     0   :  { %s28_s0 = inlined_call_operand.vmem [shape: f32[8], index: 0, kind: input, shape index: {}]   ;;  %s29_s1 = inlined_call_operand.vmem [shape: f32[16,8], index: 1, kind: output, shape index: {}]  }
   0x1   :  { %v4_v0 = vld [vmem:[%s28_s0] ss:$0 sm:$0xff] }
   0x2   :  { %5 = vst [vmem:[%s29_s1] sm:$0xff] %v4_v0  ;;  %8 = vst [vmem:[%s29_s1 + $0x8] sm:$0xff] %v4_v0 }

// kernel: tile.19
= control target key start
LH: loop header
LB: loop body
LE: loop exit
PB: predicated region body
PF: predicated region fallthrough
CT: control target
= control target key end

     0   :  { %s131_s10 = smov 120   ;;  %s132_s11 = smov 104   ;;  %vm3_vm0 = vcmask 64512   ;;  %vm9_vm1 = vcmask 1048512   ;;  %vm15_vm2 = vcmask 982912   ;;  %vm21_vm3 = vcmask 917312   ;;  %s207_s0 = inlined_call_operand.vmem [shape: f32[16,8], index: 0, kind: input, shape index: {}]   ;;  %s208_s1 = inlined_call_operand.vmem [shape: f32[1,128], index: 1, kind: output, shape index: {}]  }
   0x1   :  { %v101_v0 = vld [vmem:[%s207_s0 + $0xf] sm:$0x1]   ;;  %v103_v1 = vld [vmem:[%s207_s0 + $0xd] sm:$0x1]   ;;  %v102_v2 = vld [vmem:[%s207_s0 + $0xe] sm:$0x1]  }
   0x2   :  { %7 = vrot.lane.b32.xlu0 %v101_v0, %s131_s10  ;;  %19 = vrot.lane.b32.xlu1 %v103_v1, %s132_s11  ;;  %v104_v3 = vld [vmem:[%s207_s0 + $0xc] sm:$0x1]   ;;  %s133_s16 = smov 112   ;;  %s134_s17 = smov 96   ;;  %v105_v4 = vld [vmem:[%s207_s0 + $0xb] sm:$0x1]  }
   0x3   :  { %v106_v5 = vld [vmem:[%s207_s0 + $0xa] sm:$0x1]   ;;  %v2_v6 = vld [vmem:[%s207_s0] sm:$0x1]   ;;  %s135_s24 = smov 88   ;;  %s136_s25 = smov 80  }
   0x4   :  { %4 = vst.msk [vmem:[#allocation0] sm:$0x1] %vm3_vm0, %v2_v6   ;;  %v107_v7 = vld [vmem:[%s207_s0 + $0x9] sm:$0x1]   ;;  %v108_v8 = vld [vmem:[%s207_s0 + $0x8] sm:$0x1]  }
   0x5   :  { %s137_s30 = smov 72   ;;  %s138_s2 = smov 64   ;;  %v109_v9 = vld [vmem:[%s207_s0 + $0x7] sm:$0x1]   ;;  %v110_v10 = vld [vmem:[%s207_s0 + $0x6] sm:$0x1]  }
   0x6   :  { %13 = vrot.lane.b32.xlu0 %v102_v2, %s133_s16  ;;  %25 = vrot.lane.b32.xlu1 %v104_v3, %s134_s17  ;;  %s139_s7 = smov 56   ;;  %s140_s8 = smov 48   ;;  %v111_v11 = vld [vmem:[%s207_s0 + $0x5] sm:$0x1]   ;;  %v112_v12 = vld [vmem:[%s207_s0 + $0x4] sm:$0x1]  }
   0x7   :  { %s141_s13 = smov 40   ;;  %s142_s14 = smov 32   ;;  %v113_v13 = vld [vmem:[%s207_s0 + $0x3] sm:$0x1]   ;;  %v114_v14 = vld [vmem:[%s207_s0 + $0x2] sm:$0x1]  }
   0x8   :  { %s143_s19 = smov 24   ;;  %s144_s20 = smov 16   ;;  %v115_v15 = vld [vmem:[%s207_s0 + $0x1] sm:$0x1]   ;;  %vm27_vm4 = vcmask 851712   ;;  %vm33_vm5 = vcmask 786112  }
   0x9   :  { %s145_s0 = smov 8   ;;  %vm39_vm6 = vcmask 720512   ;;  %vm45_vm7 = vcmask 654912   ;;  %vm51_vm8 = vcmask 589312   ;;  %vm57_vm9 = vcmask 523712  }
   0xa   :  { %31 = vrot.lane.b32.xlu0 %v105_v4, %s135_s24  ;;  %37 = vrot.lane.b32.xlu1 %v106_v5, %s136_s25  ;;  %vm63_vm10 = vcmask 458112   ;;  %vm69_vm11 = vcmask 392512   ;;  %vm75_vm12 = vcmask 326912   ;;  %vm81_vm13 = vcmask 261312  }
   0xb   :  { %vm87_vm14 = vcmask 195712   ;;  %vm93_vm15 = vcmask 130112  }
   0xe   :  { %43 = vrot.lane.b32.xlu0 %v107_v7, %s137_s30  ;;  %49 = vrot.lane.b32.xlu1 %v108_v8, %s138_s2 }
  0x12   :  { %55 = vrot.lane.b32.xlu0 %v109_v9, %s139_s7  ;;  %61 = vrot.lane.b32.xlu1 %v110_v10, %s140_s8 }
  0x16   :  { %67 = vrot.lane.b32.xlu0 %v111_v11, %s141_s13  ;;  %73 = vrot.lane.b32.xlu1 %v112_v12, %s142_s14 }
  0x1a   :  { %79 = vrot.lane.b32.xlu0 %v113_v13, %s143_s19  ;;  %85 = vrot.lane.b32.xlu1 %v114_v14, %s144_s20 }
  0x1e   :  { %91 = vrot.lane.b32.xlu0 %v115_v15, %s145_s0 }
  0x74   :  { %v8_v16 = vpop.permute.xlu0 %7   ;;  %v20_v17 = vpop.permute.xlu1 %19  }
  0x75   :  { %10 = vst.msk [vmem:[#allocation0] sm:$0x1] %vm9_vm1, %v8_v16  }
  0x78   :  { %v14_v18 = vpop.permute.xlu0 %13   ;;  %v26_v19 = vpop.permute.xlu1 %25  }
  0x79   :  { %16 = vst.msk [vmem:[#allocation0] sm:$0x1] %vm15_vm2, %v14_v18  }
  0x7a   :  { %22 = vst.msk [vmem:[#allocation0] sm:$0x1] %vm21_vm3, %v20_v17  }
  0x7b   :  { %28 = vst.msk [vmem:[#allocation0] sm:$0x1] %vm27_vm4, %v26_v19  }
  0x7c   :  { %v32_v20 = vpop.permute.xlu0 %31   ;;  %v38_v21 = vpop.permute.xlu1 %37  }
  0x7d   :  { %34 = vst.msk [vmem:[#allocation0] sm:$0x1] %vm33_vm5, %v32_v20  }
  0x7e   :  { %40 = vst.msk [vmem:[#allocation0] sm:$0x1] %vm39_vm6, %v38_v21  }
  0x80   :  { %v44_v22 = vpop.permute.xlu0 %43   ;;  %v50_v23 = vpop.permute.xlu1 %49  }
  0x81   :  { %46 = vst.msk [vmem:[#allocation0] sm:$0x1] %vm45_vm7, %v44_v22  }
  0x82   :  { %52 = vst.msk [vmem:[#allocation0] sm:$0x1] %vm51_vm8, %v50_v23  }
  0x84   :  { %v56_v24 = vpop.permute.xlu0 %55   ;;  %v62_v25 = vpop.permute.xlu1 %61  }
  0x85   :  { %58 = vst.msk [vmem:[#allocation0] sm:$0x1] %vm57_vm9, %v56_v24  }
  0x86   :  { %64 = vst.msk [vmem:[#allocation0] sm:$0x1] %vm63_vm10, %v62_v25  }
  0x88   :  { %v68_v26 = vpop.permute.xlu0 %67   ;;  %v74_v27 = vpop.permute.xlu1 %73  }
  0x89   :  { %70 = vst.msk [vmem:[#allocation0] sm:$0x1] %vm69_vm11, %v68_v26  }
  0x8a   :  { %76 = vst.msk [vmem:[#allocation0] sm:$0x1] %vm75_vm12, %v74_v27  }
  0x8c   :  { %v80_v28 = vpop.permute.xlu0 %79   ;;  %v86_v29 = vpop.permute.xlu1 %85  }
  0x8d   :  { %82 = vst.msk [vmem:[#allocation0] sm:$0x1] %vm81_vm13, %v80_v28  }
  0x8e   :  { %88 = vst.msk [vmem:[#allocation0] sm:$0x1] %vm87_vm14, %v86_v29  }
  0x90   :  { %v92_v30 = vpop.permute.xlu0 %91  }
  0x91   :  { %94 = vst.msk [vmem:[#allocation0] sm:$0x1] %vm93_vm15, %v92_v30  }
  0x98   :  { %v98_v31 = vld [vmem:[#allocation0] sm:$0x1] }
  0x99   :  { %100 = vst [vmem:[%s208_s1] sm:$0x1] %v98_v31 }

// kernel: conv_transpose_bn_relu.2
= control target key start
LH: loop header
LB: loop body
LE: loop exit
PB: predicated region body
PF: predicated region fallthrough
CT: control target
= control target key end

     0   :  { %vm38_vm0 = vcmask 130048   ;;  %v393_v19 = vmov 0.0   ;;  %s555_s1 = inlined_call_operand.vmem [shape: f32[16,128], index: 1, kind: input, shape index: {}]   ;;  %s556_s0 = inlined_call_operand.vmem [shape: f32[128,16], index: 0, kind: input, shape index: {}]   ;;  %s557_s3 = inlined_call_operand.vmem [shape: f32[1,128], index: 3, kind: output, shape index: {1}]   ;;  %s558_s4 = inlined_call_operand.vmem [shape: f32[1,128], index: 4, kind: output, shape index: {2}]   ;;  %s559_s2 = inlined_call_operand.vmem [shape: f32[128,128], index: 2, kind: output, shape index: {0}]  }
   0x1   :  { %v36_v0 = vld [vmem:[%s555_s1] sm:$0xff]  ;;  %v37_v1 = vld [vmem:[%s555_s1 + $0x8] sm:$0xff]  ;;  %v22_v7 = vld [vmem:[%s556_s0 + $0x10] sm:$0xff]  ;;  %18 = vst [vmem:[%s557_s3] sm:$0x1] %v393_v19 }
   0x2   :  { %v20_v2 = vld [vmem:[%s556_s0] sm:$0xff]  ;;  %v386_v3 = vpack.c.bf16 %v37_v1, %v36_v0  ;;  %v21_v5 = vld [vmem:[%s556_s0 + $0x8] sm:$0xff]  ;;  %v30_v8 = vld [vmem:[%s556_s0 + $0x50] sm:$0xff]  ;;  %19 = vst [vmem:[%s558_s4] sm:$0x1] %v393_v19 }
   0x3   :  { %362 = vmatprep.mubr.msk.f32.mxu0 %vm38_vm0, %v20_v2  ;;  %v28_v4 = vld [vmem:[%s556_s0 + $0x40] sm:$0xff]  ;;  %v29_v6 = vld [vmem:[%s556_s0 + $0x48] sm:$0xff]  ;;  %v23_v9 = vld [vmem:[%s556_s0 + $0x18] sm:$0xff] }
   0x4   :  { %387 = vmatprep.subr.bf16.mxu0 %v386_v3  ;;  %390 = vmatprep.subr.bf16.mxu1 %v386_v3  ;;  %v31_v10 = vld [vmem:[%s556_s0 + $0x58] sm:$0xff]  ;;  %v24_v11 = vld [vmem:[%s556_s0 + $0x20] sm:$0xff]  ;;  %v25_v13 = vld [vmem:[%s556_s0 + $0x28] sm:$0xff] }
   0x5   :  { %389 = vmatpush3.bf16.msra.mxu0 %v386_v3  ;;  %391 = vmatpush3.bf16.msra.mxu1 %v386_v3  ;;  %v32_v12 = vld [vmem:[%s556_s0 + $0x60] sm:$0xff]  ;;  %v33_v14 = vld [vmem:[%s556_s0 + $0x68] sm:$0xff]  ;;  %v26_v15 = vld [vmem:[%s556_s0 + $0x30] sm:$0xff] }
   0x6   :  { %374 = vmatprep.mubr.msk.f32.mxu1 %vm38_vm0, %v28_v4  ;;  %v34_v16 = vld [vmem:[%s556_s0 + $0x70] sm:$0xff]  ;;  %v27_v17 = vld [vmem:[%s556_s0 + $0x38] sm:$0xff] }
   0x7   :  { %v35_v18 = vld [vmem:[%s556_s0 + $0x78] sm:$0xff] }
   0x8   :  { %363 = vmatmul.mubr.msk.f32.vlgmr.msra.gmra.mrb[0].mxu0 %vm38_vm0, %v21_v5  ;;  %375 = vmatmul.mubr.msk.f32.vlgmr.msra.gmra.mrb[0].mxu1 %vm38_vm0, %v29_v6 }
   0x9   :  { %365 = vmatprep.mubr.msk.f32.mxu0 %vm38_vm0, %v22_v7  ;;  %377 = vmatprep.mubr.msk.f32.mxu1 %vm38_vm0, %v30_v8 }
   0xc   :  { %366 = vmatmul.mubr.msk.f32.gmra.mrb[2].mxu0 %vm38_vm0, %v23_v9  ;;  %378 = vmatmul.mubr.msk.f32.gmra.mrb[2].mxu1 %vm38_vm0, %v31_v10 }
   0xd   :  { %368 = vmatprep.mubr.msk.f32.mxu0 %vm38_vm0, %v24_v11  ;;  %380 = vmatprep.mubr.msk.f32.mxu1 %vm38_vm0, %v32_v12 }
  0x10   :  { %369 = vmatmul.mubr.msk.f32.gmra.mrb[4].mxu0 %vm38_vm0, %v25_v13  ;;  %381 = vmatmul.mubr.msk.f32.gmra.mrb[4].mxu1 %vm38_vm0, %v33_v14 }
  0x11   :  { %371 = vmatprep.mubr.msk.f32.mxu0 %vm38_vm0, %v26_v15  ;;  %383 = vmatprep.mubr.msk.f32.mxu1 %vm38_vm0, %v34_v16 }
  0x14   :  { %372 = vmatmul.mubr.msk.f32.gmra.mrb[6].mxu0 %vm38_vm0, %v27_v17  ;;  %384 = vmatmul.mubr.msk.f32.gmra.mrb[6].mxu1 %vm38_vm0, %v35_v18 }
  0xdb   :  { %v364_v20 = vpop.f32.mrb[0].mxu0  ;;  %v376_v21 = vpop.f32.mrb[0].mxu1 }
  0xdc   :  { %233 = vst [vmem:[%s559_s2 + $0x8] sm:$0xff] %v364_v20  ;;  %v274_v22 = vmul.f32 %v364_v20, %v364_v20  ;;  %v153_v23 = vpop.f32.mrb[1].mxu0  ;;  %241 = vst [vmem:[%s559_s2 + $0x48] sm:$0xff] %v376_v21  ;;  %v193_v24 = vpop.f32.mrb[1].mxu1  ;;  %v282_v60 = vmul.f32 %v376_v21, %v376_v21 }
  0xdd   :  { %232 = vst [vmem:[%s559_s2] sm:$0xff] %v153_v23  ;;  %v249_v25 = vadd.f32 %v364_v20, %v153_v23  ;;  %v273_v26 = vmul.f32 %v153_v23, %v153_v23  ;;  %240 = vst [vmem:[%s559_s2 + $0x40] sm:$0xff] %v193_v24  ;;  %v281_v57 = vmul.f32 %v193_v24, %v193_v24 }
  0xdf   :  { %v289_v27 = vadd.f32 %v274_v22, %v273_v26  ;;  %v367_v28 = vpop.f32.mrb[2].mxu0  ;;  %v379_v29 = vpop.f32.mrb[2].mxu1 }
  0xe0   :  { %235 = vst [vmem:[%s559_s2 + $0x18] sm:$0xff] %v367_v28  ;;  %v163_v30 = vpop.f32.mrb[3].mxu0  ;;  %243 = vst [vmem:[%s559_s2 + $0x58] sm:$0xff] %v379_v29  ;;  %v203_v31 = vpop.f32.mrb[3].mxu1  ;;  %v276_v34 = vmul.f32 %v367_v28, %v367_v28  ;;  %v284_v2 = vmul.f32 %v379_v29, %v379_v29 }
  0xe1   :  { %234 = vst [vmem:[%s559_s2 + $0x10] sm:$0xff] %v163_v30  ;;  %v250_v32 = vadd.f32 %v249_v25, %v163_v30  ;;  %v275_v33 = vmul.f32 %v163_v30, %v163_v30  ;;  %242 = vst [vmem:[%s559_s2 + $0x50] sm:$0xff] %v203_v31  ;;  %v283_v63 = vmul.f32 %v203_v31, %v203_v31  ;;  %v272_v30 = vld [vmem:[%s558_s4] sm:$0x1] }
  0xe3   :  { %v290_v35 = vadd.f32 %v289_v27, %v275_v33  ;;  %v370_v36 = vpop.f32.mrb[4].mxu0  ;;  %v251_v37 = vadd.f32 %v367_v28, %v250_v32  ;;  %v382_v38 = vpop.f32.mrb[4].mxu1  ;;  %v248_v27 = vld [vmem:[%s557_s3] sm:$0x1] }
  0xe4   :  { %237 = vst [vmem:[%s559_s2 + $0x28] sm:$0xff] %v370_v36  ;;  %v173_v39 = vpop.f32.mrb[5].mxu0  ;;  %245 = vst [vmem:[%s559_s2 + $0x68] sm:$0xff] %v382_v38  ;;  %v213_v40 = vpop.f32.mrb[5].mxu1  ;;  %v278_v44 = vmul.f32 %v370_v36, %v370_v36  ;;  %v286_v8 = vmul.f32 %v382_v38, %v382_v38 }
  0xe5   :  { %236 = vst [vmem:[%s559_s2 + $0x20] sm:$0xff] %v173_v39  ;;  %v252_v41 = vadd.f32 %v251_v37, %v173_v39  ;;  %v277_v42 = vmul.f32 %v173_v39, %v173_v39  ;;  %v291_v43 = vadd.f32 %v290_v35, %v276_v34  ;;  %244 = vst [vmem:[%s559_s2 + $0x60] sm:$0xff] %v213_v40 }
  0xe6   :  { %v285_v5 = vmul.f32 %v213_v40, %v213_v40 }
  0xe7   :  { %v292_v45 = vadd.f32 %v291_v43, %v277_v42  ;;  %v373_v46 = vpop.f32.mrb[6].mxu0  ;;  %v253_v47 = vadd.f32 %v370_v36, %v252_v41  ;;  %v385_v48 = vpop.f32.mrb[6].mxu1 }
  0xe8   :  { %239 = vst [vmem:[%s559_s2 + $0x38] sm:$0xff] %v373_v46  ;;  %v183_v49 = vpop.f32.mrb[7].mxu0  ;;  %247 = vst [vmem:[%s559_s2 + $0x78] sm:$0xff] %v385_v48  ;;  %v223_v50 = vpop.f32.mrb[7].mxu1  ;;  %v280_v54 = vmul.f32 %v373_v46, %v373_v46  ;;  %v288_v14 = vmul.f32 %v385_v48, %v385_v48 }
  0xe9   :  { %238 = vst [vmem:[%s559_s2 + $0x30] sm:$0xff] %v183_v49  ;;  %v254_v51 = vadd.f32 %v253_v47, %v183_v49  ;;  %v279_v52 = vmul.f32 %v183_v49, %v183_v49  ;;  %v293_v53 = vadd.f32 %v292_v45, %v278_v44  ;;  %246 = vst [vmem:[%s559_s2 + $0x70] sm:$0xff] %v223_v50 }
  0xea   :  { %v287_v11 = vmul.f32 %v223_v50, %v223_v50 }
  0xeb   :  { %v255_v55 = vadd.f32 %v373_v46, %v254_v51  ;;  %v294_v56 = vadd.f32 %v293_v53, %v279_v52 }
  0xed   :  { %v295_v58 = vadd.f32 %v294_v56, %v280_v54  ;;  %v256_v59 = vadd.f32 %v255_v55, %v193_v24 }
  0xef   :  { %v296_v61 = vadd.f32 %v295_v58, %v281_v57  ;;  %v257_v62 = vadd.f32 %v376_v21, %v256_v59 }
  0xf1   :  { %v258_v0 = vadd.f32 %v257_v62, %v203_v31  ;;  %v297_v1 = vadd.f32 %v296_v61, %v282_v60 }
  0xf3   :  { %v298_v3 = vadd.f32 %v297_v1, %v283_v63  ;;  %v259_v4 = vadd.f32 %v379_v29, %v258_v0 }
  0xf5   :  { %v260_v6 = vadd.f32 %v259_v4, %v213_v40  ;;  %v299_v7 = vadd.f32 %v298_v3, %v284_v2 }
  0xf7   :  { %v300_v9 = vadd.f32 %v299_v7, %v285_v5  ;;  %v261_v10 = vadd.f32 %v382_v38, %v260_v6 }
  0xf9   :  { %v262_v12 = vadd.f32 %v261_v10, %v223_v50  ;;  %v301_v13 = vadd.f32 %v300_v9, %v286_v8 }
  0xfb   :  { %v263_v15 = vadd.f32 %v385_v48, %v262_v12  ;;  %v302_v16 = vadd.f32 %v301_v13, %v287_v11 }
  0xfd   :  { %v264_v17 = vrot.slane %v263_v15, 4  ;;  %v303_v18 = vadd.f32 %v302_v16, %v288_v14 }
  0xff   :  { %v265_v19 = vadd.f32 %v264_v17, %v263_v15  ;;  %v304_v20 = vrot.slane %v303_v18, 4 }
 0x101   :  { %v266_v21 = vrot.slane %v265_v19, 2  ;;  %v305_v22 = vadd.f32 %v304_v20, %v303_v18 }
 0x103   :  { %v267_v23 = vadd.f32 %v266_v21, %v265_v19  ;;  %v306_v24 = vrot.slane %v305_v22, 2 }
 0x105   :  { %v268_v25 = vrot.slane %v267_v23, 1  ;;  %v307_v26 = vadd.f32 %v306_v24, %v305_v22 }
 0x107   :  { %v269_v28 = vadd.f32 %v268_v25, %v267_v23  ;;  %v308_v29 = vrot.slane %v307_v26, 1 }
 0x109   :  { %v270_v31 = vadd.f32 %v269_v28, %v248_v27  ;;  %v309_v32 = vadd.f32 %v308_v29, %v307_v26 }
 0x10b   :  { %271 = vst [vmem:[%s557_s3] sm:$0x1] %v270_v31  ;;  %v310_v33 = vadd.f32 %v309_v32, %v272_v30 }
 0x10d   :  { %311 = vst [vmem:[%s558_s4] sm:$0x1] %v310_v33 }

// kernel: conv_transpose_bn_relu.3
= control target key start
LH: loop header
LB: loop body
LE: loop exit
PB: predicated region body
PF: predicated region fallthrough
CT: control target
= control target key end

     0   :  { %s651_s0 = inlined_call_operand.vmem [shape: f32[128,128], index: 0, kind: input, shape index: {}]   ;;  %s652_s1 = inlined_call_operand.vmem [shape: f32[1,128], index: 1, kind: input, shape index: {}]   ;;  %s653_s2 = inlined_call_operand.vmem [shape: f32[1,128], index: 2, kind: input, shape index: {}]   ;;  %s654_s3 = inlined_call_operand.vmem [shape: f32[128,128], index: 3, kind: output, shape index: {}]  }
   0x1   :  { %v14_v0 = vld [vmem:[%s651_s0] sm:$0xff]  ;;  %v15_v4 = vld [vmem:[%s651_s0 + $0x8] sm:$0xff]  ;;  %v16_v5 = vld [vmem:[%s651_s0 + $0x10] sm:$0xff] }
   0x2   :  { %v412_v1 = vld [vmem:[%s652_s1] ss:$0 sm:$0xff]  ;;  %v17_v6 = vld [vmem:[%s651_s0 + $0x18] sm:$0xff]  ;;  %v19_v11 = vld [vmem:[%s651_s0 + $0x28] sm:$0xff] }
   0x3   :  { %v417_v2 = vld [vmem:[%s653_s2] ss:$0 sm:$0xff]  ;;  %v37_v3 = vmul.f32 %v412_v1, %v14_v0  ;;  %v38_v7 = vmul.f32 %v412_v1, %v15_v4  ;;  %v39_v8 = vmul.f32 %v412_v1, %v16_v5  ;;  %v40_v9 = vmul.f32 %v412_v1, %v17_v6  ;;  %v20_v12 = vld [vmem:[%s651_s0 + $0x30] sm:$0xff]  ;;  %v21_v16 = vld [vmem:[%s651_s0 + $0x38] sm:$0xff] }
   0x4   :  { %v18_v10 = vld [vmem:[%s651_s0 + $0x20] sm:$0xff]  ;;  %v42_v15 = vmul.f32 %v412_v1, %v19_v11  ;;  %v43_v20 = vmul.f32 %v412_v1, %v20_v12  ;;  %v44_v24 = vmul.f32 %v412_v1, %v21_v16  ;;  %v23_v28 = vld [vmem:[%s651_s0 + $0x48] sm:$0xff]  ;;  %v24_v31 = vld [vmem:[%s651_s0 + $0x50] sm:$0xff] }
   0x5   :  { %v442_v13 = vadd.f32 %v417_v2, %v37_v3  ;;  %v41_v14 = vmul.f32 %v412_v1, %v18_v10  ;;  %v450_v17 = vadd.f32 %v417_v2, %v38_v7  ;;  %v453_v18 = vadd.f32 %v417_v2, %v39_v8  ;;  %v22_v27 = vld [vmem:[%s651_s0 + $0x40] sm:$0xff]  ;;  %v25_v32 = vld [vmem:[%s651_s0 + $0x58] sm:$0xff]  ;;  %v27_v55 = vld [vmem:[%s651_s0 + $0x68] sm:$0xff] }
   0x6   :  { %v456_v19 = vadd.f32 %v417_v2, %v40_v9  ;;  %v464_v23 = vadd.f32 %v417_v2, %v42_v15  ;;  %v485_v34 = vadd.f32 %v417_v2, %v43_v20  ;;  %v488_v35 = vadd.f32 %v417_v2, %v44_v24  ;;  %v26_v46 = vld [vmem:[%s651_s0 + $0x60] sm:$0xff]  ;;  %v28_v58 = vld [vmem:[%s651_s0 + $0x70] sm:$0xff]  ;;  %v29_v3 = vld [vmem:[%s651_s0 + $0x78] sm:$0xff] }
   0x7   :  { %v306_v21 = vmul.f32 -1.442695, %v442_v13  ;;  %v461_v22 = vadd.f32 %v417_v2, %v41_v14  ;;  %v307_v25 = vmul.f32 -1.442695, %v450_v17  ;;  %v308_v26 = vmul.f32 -1.442695, %v453_v18 }
   0x8   :  { %v309_v29 = vmul.f32 -1.442695, %v456_v19  ;;  %v311_v33 = vmul.f32 -1.442695, %v464_v23  ;;  %v45_v36 = vmul.f32 %v412_v1, %v22_v27  ;;  %v46_v37 = vmul.f32 %v412_v1, %v23_v28 }
   0x9   :  { %322 = vpow2.f32 %v306_v21  ;;  %v310_v30 = vmul.f32 -1.442695, %v461_v22  ;;  %v47_v38 = vmul.f32 %v412_v1, %v24_v31  ;;  %v48_v39 = vmul.f32 %v412_v1, %v25_v32 }
   0xa   :  { %324 = vpow2.f32 %v307_v25  ;;  %v312_v40 = vmul.f32 -1.442695, %v485_v34  ;;  %v313_v41 = vmul.f32 -1.442695, %v488_v35  ;;  %v497_v42 = vadd.f32 %v417_v2, %v45_v36 }
   0xb   :  { %326 = vpow2.f32 %v308_v26  ;;  %v500_v43 = vadd.f32 %v417_v2, %v46_v37  ;;  %v503_v44 = vadd.f32 %v417_v2, %v47_v38  ;;  %v506_v45 = vadd.f32 %v417_v2, %v48_v39 }
   0xc   :  { %328 = vpow2.f32 %v309_v29  ;;  %v314_v47 = vmul.f32 -1.442695, %v497_v42  ;;  %v49_v51 = vmul.f32 %v412_v1, %v26_v46  ;;  %v50_v0 = vmul.f32 %v412_v1, %v27_v55 }
   0xd   :  { %330 = vpow2.f32 %v310_v30  ;;  %v315_v48 = vmul.f32 -1.442695, %v500_v43  ;;  %v316_v49 = vmul.f32 -1.442695, %v503_v44  ;;  %v317_v50 = vmul.f32 -1.442695, %v506_v45 }
   0xe   :  { %332 = vpow2.f32 %v311_v33  ;;  %v523_v61 = vadd.f32 %v417_v2, %v49_v51  ;;  %v51_v6 = vmul.f32 %v412_v1, %v28_v58  ;;  %v52_v12 = vmul.f32 %v412_v1, %v29_v3 }
   0xf   :  { %334 = vpow2.f32 %v312_v40  ;;  %v533_v15 = vadd.f32 %v417_v2, %v50_v0  ;;  %vm236_vm0 = vcmp.ge.f32.partialorder %v442_v13, 0.0  ;;  %vm237_vm1 = vcmp.ge.f32.partialorder %v450_v17, 0.0 }
  0x10   :  { %336 = vpow2.f32 %v313_v41  ;;  %v318_v11 = vmul.f32 -1.442695, %v523_v61  ;;  %v536_v20 = vadd.f32 %v417_v2, %v51_v6  ;;  %vm238_vm2 = vcmp.ge.f32.partialorder %v453_v18, 0.0 }
  0x11   :  { %338 = vpow2.f32 %v314_v47  ;;  %v542_v26 = vadd.f32 %v417_v2, %v52_v12  ;;  %vm239_vm3 = vcmp.ge.f32.partialorder %v456_v19, 0.0  ;;  %v319_v29 = vmul.f32 -1.442695, %v533_v15 }
  0x12   :  { %340 = vpow2.f32 %v315_v48  ;;  %vm240_vm4 = vcmp.ge.f32.partialorder %v461_v22, 0.0  ;;  %v320_v32 = vmul.f32 -1.442695, %v536_v20  ;;  %vm241_vm5 = vcmp.ge.f32.partialorder %v464_v23, 0.0 }
  0x13   :  { %v323_v52 = vpop.eup %322  ;;  %342 = vpow2.f32 %v316_v49  ;;  %v550_v40 = vmul.f32 -1.442695, %v542_v26  ;;  %vm242_vm6 = vcmp.ge.f32.partialorder %v485_v34, 0.0  ;;  %vm243_vm7 = vcmp.ge.f32.partialorder %v488_v35, 0.0 }
  0x14   :  { %v325_v53 = vpop.eup %324  ;;  %v124_v54 = vadd.f32 1.0, %v323_v52  ;;  %344 = vpow2.f32 %v317_v50  ;;  %vm244_vm8 = vcmp.ge.f32.partialorder %v497_v42, 0.0  ;;  %vm245_vm9 = vcmp.ge.f32.partialorder %v500_v43, 0.0 }
  0x15   :  { %v327_v56 = vpop.eup %326  ;;  %v125_v57 = vadd.f32 1.0, %v325_v53  ;;  %vm246_vm10 = vcmp.ge.f32.partialorder %v503_v44, 0.0  ;;  %vm247_vm11 = vcmp.ge.f32.partialorder %v506_v45, 0.0  ;;  %vm248_vm12 = vcmp.ge.f32.partialorder %v523_v61, 0.0 }
  0x16   :  { %v329_v59 = vpop.eup %328  ;;  %346 = vrcp.f32 %v124_v54  ;;  %v126_v60 = vadd.f32 1.0, %v327_v56  ;;  %vm249_vm13 = vcmp.ge.f32.partialorder %v533_v15, 0.0  ;;  %vm250_vm14 = vcmp.ge.f32.partialorder %v536_v20, 0.0 }
  0x17   :  { %v331_v62 = vpop.eup %330  ;;  %348 = vrcp.f32 %v125_v57  ;;  %v127_v63 = vadd.f32 1.0, %v329_v59  ;;  %vm251_vm15 = vcmp.ge.f32.partialorder %v542_v26, 0.0 }
  0x18   :  { %v333_v4 = vpop.eup %332  ;;  %350 = vrcp.f32 %v126_v60  ;;  %v128_v5 = vadd.f32 1.0, %v331_v62 }
  0x19   :  { %v335_v7 = vpop.eup %334  ;;  %352 = vrcp.f32 %v127_v63  ;;  %v129_v8 = vadd.f32 1.0, %v333_v4 }
  0x1a   :  { %v337_v9 = vpop.eup %336  ;;  %354 = vrcp.f32 %v128_v5  ;;  %v130_v10 = vadd.f32 1.0, %v335_v7 }
  0x1b   :  { %356 = vrcp.f32 %v129_v8  ;;  %v131_v14 = vadd.f32 1.0, %v337_v9  ;;  %v339_v16 = vpop.eup %338 }
  0x1c   :  { %358 = vrcp.f32 %v130_v10  ;;  %v341_v21 = vpop.eup %340  ;;  %v132_v24 = vadd.f32 1.0, %v339_v16 }
  0x1d   :  { %360 = vrcp.f32 %v131_v14  ;;  %v343_v25 = vpop.eup %342  ;;  %v133_v1 = vadd.f32 1.0, %v341_v21 }
  0x1e   :  { %362 = vpow2.f32 %v318_v11  ;;  %v345_v27 = vpop.eup %344  ;;  %v134_v28 = vadd.f32 1.0, %v343_v25 }
  0x1f   :  { %364 = vrcp.f32 %v132_v24  ;;  %v135_v31 = vadd.f32 1.0, %v345_v27 }
  0x20   :  { %v347_v30 = vpop.eup %346  ;;  %366 = vrcp.f32 %v133_v1 }
  0x21   :  { %v349_v33 = vpop.eup %348  ;;  %v172_v36 = vmul.f32 0.8, %v347_v30  ;;  %v204_v37 = vmul.f32 1.44, %v347_v30  ;;  %368 = vrcp.f32 %v134_v28 }
  0x22   :  { %v351_v2 = vpop.eup %350  ;;  %v173_v38 = vmul.f32 0.8, %v349_v33  ;;  %v205_v39 = vmul.f32 1.44, %v349_v33  ;;  %370 = vrcp.f32 %v135_v31 }
  0x23   :  { %v353_v41 = vpop.eup %352  ;;  %v188_v46 = vadd.f32 1.1, %v172_v36  ;;  %v220_v47 = vadd.f32 0.2, %v204_v37  ;;  %v174_v48 = vmul.f32 0.8, %v351_v2  ;;  %372 = vpow2.f32 %v319_v29 }
  0x24   :  { %v355_v49 = vpop.eup %354  ;;  %v189_v50 = vadd.f32 1.1, %v173_v38  ;;  %v221_v51 = vadd.f32 0.2, %v205_v39  ;;  %v206_v52 = vmul.f32 1.44, %v351_v2  ;;  %374 = vpow2.f32 %v320_v32 }
  0x25   :  { %v357_v53 = vpop.eup %356  ;;  %v252_v54 = vsel %vm236_vm0, %v188_v46, %v220_v47  ;;  %v190_v55 = vadd.f32 1.1, %v174_v48  ;;  %v175_v56 = vmul.f32 0.8, %v353_v41  ;;  %v207_v57 = vmul.f32 1.44, %v353_v41 }
  0x26   :  { %v359_v58 = vpop.eup %358  ;;  %v268_v59 = vmul.f32 %v252_v54, %v442_v13  ;;  %v253_v60 = vsel %vm237_vm1, %v189_v50, %v221_v51  ;;  %v222_v62 = vadd.f32 0.2, %v206_v52  ;;  %v176_v63 = vmul.f32 0.8, %v355_v49 }
  0x27   :  { %v361_v0 = vpop.eup %360  ;;  %v269_v3 = vmul.f32 %v253_v60, %v450_v17  ;;  %v191_v4 = vadd.f32 1.1, %v175_v56  ;;  %v223_v5 = vadd.f32 0.2, %v207_v57  ;;  %v208_v6 = vmul.f32 1.44, %v355_v49 }
  0x28   :  { %v363_v7 = vpop.eup %362  ;;  %284 = vst [vmem:[%s654_s3] sm:$0xff] %v268_v59  ;;  %v254_v13 = vsel %vm238_vm2, %v190_v55, %v222_v62  ;;  %v192_v8 = vadd.f32 1.1, %v176_v63  ;;  %v177_v9 = vmul.f32 0.8, %v357_v53  ;;  %v209_v10 = vmul.f32 1.44, %v357_v53 }
  0x29   :  { %v365_v11 = vpop.eup %364  ;;  %285 = vst [vmem:[%s654_s3 + $0x8] sm:$0xff] %v269_v3  ;;  %v270_v17 = vmul.f32 %v254_v13, %v453_v18  ;;  %v255_v12 = vsel %vm239_vm3, %v191_v4, %v223_v5  ;;  %v224_v14 = vadd.f32 0.2, %v208_v6  ;;  %v178_v16 = vmul.f32 0.8, %v359_v58 }
  0x2a   :  { %v367_v21 = vpop.eup %366  ;;  %v271_v24 = vmul.f32 %v255_v12, %v456_v19  ;;  %v193_v25 = vadd.f32 1.1, %v177_v9  ;;  %v225_v1 = vadd.f32 0.2, %v209_v10  ;;  %v210_v27 = vmul.f32 1.44, %v359_v58 }
  0x2b   :  { %v369_v28 = vpop.eup %368  ;;  %286 = vst [vmem:[%s654_s3 + $0x10] sm:$0xff] %v270_v17  ;;  %v256_v18 = vsel %vm240_vm4, %v192_v8, %v224_v14  ;;  %v194_v29 = vadd.f32 1.1, %v178_v16  ;;  %v179_v30 = vmul.f32 0.8, %v361_v0 }
  0x2c   :  { %v211_v31 = vmul.f32 1.44, %v361_v0  ;;  %v371_v32 = vpop.eup %370  ;;  %287 = vst [vmem:[%s654_s3 + $0x18] sm:$0xff] %v271_v24  ;;  %v272_v19 = vmul.f32 %v256_v18, %v461_v22  ;;  %v257_v33 = vsel %vm241_vm5, %v193_v25, %v225_v1  ;;  %v226_v36 = vadd.f32 0.2, %v210_v27 }
  0x2d   :  { %v180_v37 = vmul.f32 0.8, %v365_v11  ;;  %v373_v2 = vpop.eup %372  ;;  %v273_v38 = vmul.f32 %v257_v33, %v464_v23  ;;  %v195_v39 = vadd.f32 1.1, %v179_v30  ;;  %v212_v46 = vmul.f32 1.44, %v365_v11 }
  0x2e   :  { %v227_v41 = vadd.f32 0.2, %v211_v31  ;;  %v375_v47 = vpop.eup %374  ;;  %288 = vst [vmem:[%s654_s3 + $0x20] sm:$0xff] %v272_v19  ;;  %v258_v48 = vsel %vm242_vm6, %v194_v29, %v226_v36  ;;  %v181_v49 = vmul.f32 0.8, %v367_v21  ;;  %v136_v0 = vadd.f32 1.0, %v363_v7 }
  0x2f   :  { %v196_v22 = vadd.f32 1.1, %v180_v37  ;;  %v213_v50 = vmul.f32 1.44, %v367_v21  ;;  %289 = vst [vmem:[%s654_s3 + $0x28] sm:$0xff] %v273_v38  ;;  %v274_v23 = vmul.f32 %v258_v48, %v485_v34  ;;  %v137_v6 = vadd.f32 1.0, %v373_v2 }
  0x30   :  { %v259_v51 = vsel %vm243_vm7, %v195_v39, %v227_v41  ;;  %v228_v52 = vadd.f32 0.2, %v212_v46  ;;  %v182_v53 = vmul.f32 0.8, %v369_v28  ;;  %v197_v55 = vadd.f32 1.1, %v181_v49 }
  0x31   :  { %v275_v54 = vmul.f32 %v259_v51, %v488_v35  ;;  %v229_v56 = vadd.f32 0.2, %v213_v50  ;;  %v214_v57 = vmul.f32 1.44, %v369_v28  ;;  %290 = vst [vmem:[%s654_s3 + $0x30] sm:$0xff] %v274_v23  ;;  %376 = vrcp.f32 %v136_v0 }
  0x32   :  { %v260_v58 = vsel %vm244_vm8, %v196_v22, %v228_v52  ;;  %v198_v59 = vadd.f32 1.1, %v182_v53  ;;  %v183_v60 = vmul.f32 0.8, %v371_v32  ;;  %v215_v34 = vmul.f32 1.44, %v371_v32 }
  0x33   :  { %291 = vst [vmem:[%s654_s3 + $0x38] sm:$0xff] %v275_v54  ;;  %v276_v62 = vmul.f32 %v260_v58, %v497_v42  ;;  %v261_v35 = vsel %vm245_vm9, %v197_v55, %v229_v56  ;;  %v230_v63 = vadd.f32 0.2, %v214_v57  ;;  %v138_v8 = vadd.f32 1.0, %v375_v47 }
  0x34   :  { %v277_v3 = vmul.f32 %v261_v35, %v500_v43  ;;  %v199_v4 = vadd.f32 1.1, %v183_v60  ;;  %v231_v5 = vadd.f32 0.2, %v215_v34  ;;  %378 = vrcp.f32 %v137_v6 }
  0x35   :  { %292 = vst [vmem:[%s654_s3 + $0x40] sm:$0xff] %v276_v62  ;;  %v262_v13 = vsel %vm246_vm10, %v198_v59, %v230_v63  ;;  %380 = vrcp.f32 %v138_v8 }
  0x36   :  { %293 = vst [vmem:[%s654_s3 + $0x48] sm:$0xff] %v277_v3  ;;  %v278_v42 = vmul.f32 %v262_v13, %v503_v44  ;;  %v263_v43 = vsel %vm247_vm11, %v199_v4, %v231_v5  ;;  %382 = vpow2.f32 %v550_v40 }
  0x37   :  { %v279_v7 = vmul.f32 %v263_v43, %v506_v45 }
  0x38   :  { %294 = vst [vmem:[%s654_s3 + $0x50] sm:$0xff] %v278_v42 }
  0x39   :  { %295 = vst [vmem:[%s654_s3 + $0x58] sm:$0xff] %v279_v7 }
  0x3b   :  { %v377_v9 = vpop.eup %376 }
  0x3c   :  { %v184_v44 = vmul.f32 0.8, %v377_v9  ;;  %v216_v11 = vmul.f32 1.44, %v377_v9 }
  0x3e   :  { %v379_v10 = vpop.eup %378  ;;  %v200_v16 = vadd.f32 1.1, %v184_v44  ;;  %v232_v21 = vadd.f32 0.2, %v216_v11 }
  0x3f   :  { %v381_v17 = vpop.eup %380  ;;  %v185_v12 = vmul.f32 0.8, %v379_v10  ;;  %v217_v45 = vmul.f32 1.44, %v379_v10 }
  0x40   :  { %v383_v14 = vpop.eup %382  ;;  %v186_v24 = vmul.f32 0.8, %v381_v17  ;;  %v218_v1 = vmul.f32 1.44, %v381_v17  ;;  %v264_v27 = vsel %vm248_vm12, %v200_v16, %v232_v21 }
  0x41   :  { %v201_v40 = vadd.f32 1.1, %v185_v12  ;;  %v233_v25 = vadd.f32 0.2, %v217_v45  ;;  %v139_v18 = vadd.f32 1.0, %v383_v14  ;;  %v280_v29 = vmul.f32 %v264_v27, %v523_v61 }
  0x42   :  { %v202_v28 = vadd.f32 1.1, %v186_v24  ;;  %v234_v31 = vadd.f32 0.2, %v218_v1 }
  0x43   :  { %v265_v30 = vsel %vm249_vm13, %v201_v40, %v233_v25  ;;  %384 = vrcp.f32 %v139_v18  ;;  %296 = vst [vmem:[%s654_s3 + $0x60] sm:$0xff] %v280_v29 }
  0x44   :  { %v281_v32 = vmul.f32 %v265_v30, %v533_v15  ;;  %v266_v19 = vsel %vm250_vm14, %v202_v28, %v234_v31 }
  0x45   :  { %v282_v33 = vmul.f32 %v266_v19, %v536_v20 }
  0x46   :  { %297 = vst [vmem:[%s654_s3 + $0x68] sm:$0xff] %v281_v32 }
  0x47   :  { %298 = vst [vmem:[%s654_s3 + $0x70] sm:$0xff] %v282_v33 }
  0x4d   :  { %v385_v61 = vpop.eup %384 }
  0x4e   :  { %v187_v36 = vmul.f32 0.8, %v385_v61  ;;  %v219_v37 = vmul.f32 1.44, %v385_v61 }
  0x50   :  { %v203_v15 = vadd.f32 1.1, %v187_v36  ;;  %v235_v2 = vadd.f32 0.2, %v219_v37 }
  0x52   :  { %v267_v38 = vsel %vm251_vm15, %v203_v15, %v235_v2 }
  0x53   :  { %v283_v39 = vmul.f32 %v267_v38, %v542_v26 }
  0x55   :  { %299 = vst [vmem:[%s654_s3 + $0x78] sm:$0xff] %v283_v39 }

</bundles_post_ra>
